<compile_context>
chip_gen: v6e
topology: v6e:2x2x1
jax: 0.10.0
libtpu: 0.0.40
codegen_flags: <defaults>
</compile_context>

<pallas_src>
import functools

import jax
import jax.numpy as jnp
from jax.experimental import pallas as pl
from jax.experimental.pallas import tpu as pltpu

LANE = 128          # channel padding target (lane-dense stores)
EDGE_TILE = 128     # edges per grid step


def _round_up(v, m):
    return ((v + m - 1) // m) * m


# ----------------------------------------------------------------------------
# Pallas kernel: all three CGConv layers (+ fused ReLU, optional fused dropout)
# ----------------------------------------------------------------------------
def _l3cgconv_kernel(dropout_p, training, cp,
                     seed_ref, x0_ref, gd_ref, gs_ref, s_ref, w_ref, b_ref,
                     out_ref, xbf_ref):
    l = pl.program_id(0)                      # layer index (0..2)
    e = pl.program_id(1)                      # edge-tile index
    last_e = pl.num_programs(1) - 1

    @pl.when(e == 0)
    def _layer_start():
        @pl.when(l == 0)
        def _():
            # Residual term: accumulator starts at the layer input (f32).
            out_ref[...] = x0_ref[...]
        # Snapshot the layer input in bf16 for the in-kernel gathers.
        xbf_ref[...] = out_ref[...].astype(jnp.bfloat16)

    # In-kernel gather of per-edge dst/src features via 0/1 matrices (MXU).
    x_bf = xbf_ref[...]
    zd = jnp.dot(gd_ref[...], x_bf,
                 preferred_element_type=jnp.float32).astype(jnp.bfloat16)
    zs = jnp.dot(gs_ref[...], x_bf,
                 preferred_element_type=jnp.float32).astype(jnp.bfloat16)

    # Fused gate/core pre-activation with stacked weights:
    #   rows [0:cp] of W act on x_dst, rows [cp:] on x_src;
    #   columns [0:cp] -> sigmoid branch (W_f), columns [cp:] -> softplus (W_s).
    zw = (jnp.dot(zd, w_ref[0:cp, :], preferred_element_type=jnp.float32)
          + jnp.dot(zs, w_ref[cp:, :], preferred_element_type=jnp.float32)
          + b_ref[...])
    g = zw[:, :cp]
    s_pre = zw[:, cp:]

    # Manual, Mosaic-safe sigmoid / softplus (exp/log/abs/max only; EUP path).
    gate = 1.0 / (1.0 + jnp.exp(-g))
    core = jnp.maximum(s_pre, 0.0) + jnp.log(1.0 + jnp.exp(-jnp.abs(s_pre)))
    m = (gate * core).astype(jnp.bfloat16)                 # (TE, Cp) messages

    # Scatter-add messages to destination nodes (MXU matmul, f32 accumulation).
    out_ref[...] += jnp.dot(s_ref[...], m, preferred_element_type=jnp.float32)

    @pl.when(e == last_e)
    def _finalize():
        out_ref[...] = jnp.maximum(out_ref[...], 0.0)       # fused ReLU
        if training and dropout_p > 0.0:
            # Dropout only after conv1 and conv2 (not conv3), per the module.
            @pl.when(l < 2)
            def _drop():
                # Inverted dropout with the TPU hardware PRNG (same
                # distribution as torch dropout, different RNG stream).
                pltpu.prng_seed(seed_ref[0] + l)
                bits = pltpu.bitcast(
                    pltpu.prng_random_bits(out_ref.shape), jnp.uint32)
                u = (bits >> 9).astype(jnp.float32) * (1.0 / (1 << 23))
                out_ref[...] = jnp.where(
                    u >= dropout_p,
                    out_ref[...] * (1.0 / (1.0 - dropout_p)),
                    0.0)


def _l3cgconv_pallas(x_p, gd_bf, gs_bf, s_bf, w_all, b_all, *,
                     dropout_p=0.1, training=False, seed=0):
    n_pad, cp = x_p.shape
    e_pad = gd_bf.shape[0]
    te = EDGE_TILE
    two_cp = 2 * cp
    seed_arr = jnp.array([seed], jnp.int32)
    kernel = functools.partial(_l3cgconv_kernel, dropout_p, training, cp)

    return pl.pallas_call(
        kernel,
        out_shape=jax.ShapeDtypeStruct((n_pad, cp), jnp.float32),
        grid=(3, e_pad // te),
        in_specs=[
            pl.BlockSpec(memory_space=pltpu.MemorySpace.SMEM),        # seed (1,)
            pl.BlockSpec((n_pad, cp), lambda l, e: (0, 0)),           # x0
            pl.BlockSpec((te, n_pad), lambda l, e: (e, 0)),           # gather dst
            pl.BlockSpec((te, n_pad), lambda l, e: (e, 0)),           # gather src
            pl.BlockSpec((n_pad, te), lambda l, e: (0, e)),           # scatter
            pl.BlockSpec((None, two_cp, two_cp), lambda l, e: (l, 0, 0)),  # [Wf|Ws]
            pl.BlockSpec((None, 1, two_cp), lambda l, e: (l, 0, 0)),       # [bf|bs]
        ],
        out_specs=pl.BlockSpec((n_pad, cp), lambda l, e: (0, 0)),     # accumulator
        scratch_shapes=[pltpu.VMEM((n_pad, cp), jnp.bfloat16)],       # x snapshot
        compiler_params=pltpu.CompilerParams(
            dimension_semantics=("arbitrary", "arbitrary")),
    )(seed_arr, x_p, gd_bf, gs_bf, s_bf, w_all, b_all)


# ----------------------------------------------------------------------------
# Weight packing: real (2C, C) blocks into a padded, stacked (2Cp, 2Cp) matrix
# ----------------------------------------------------------------------------
def _pack_layer(p, cp):
    c = p["wf"].shape[1]
    w = jnp.zeros((2 * cp, 2 * cp), jnp.float32)
    # row layout: [dst channels (padded to cp) | src channels (padded to cp)]
    w = w.at[0:c, 0:c].set(p["wf"][0:c, :])              # dst rows of W_f
    w = w.at[cp:cp + c, 0:c].set(p["wf"][c:2 * c, :])    # src rows of W_f
    w = w.at[0:c, cp:cp + c].set(p["ws"][0:c, :])        # dst rows of W_s
    w = w.at[cp:cp + c, cp:cp + c].set(p["ws"][c:2 * c, :])
    b = jnp.zeros((1, 2 * cp), jnp.float32)
    b = b.at[0, 0:c].set(p["bf"])
    b = b.at[0, cp:cp + c].set(p["bs"])
    return w.astype(jnp.bfloat16), b


# ----------------------------------------------------------------------------
# L3CGConv forward (glue in plain JAX: padding + dense gather/scatter matrices)
# ----------------------------------------------------------------------------
def l3cgconv_forward(x, edge_index, params, *, training=False, seed=0):
    n, c = x.shape
    cp = _round_up(c, LANE)
    n_pad = _round_up(n, 8)
    src = edge_index[0].astype(jnp.int32)
    dst = edge_index[1].astype(jnp.int32)
    e = src.shape[0]
    e_pad = _round_up(max(e, 1), EDGE_TILE)

    # Pad nodes / edge list; padded edges get all-zero gather/scatter entries.
    x_p = jnp.zeros((n_pad, cp), jnp.float32).at[:n, :c].set(
        x.astype(jnp.float32))
    src_p = jnp.zeros((e_pad,), jnp.int32).at[:e].set(src)
    dst_p = jnp.zeros((e_pad,), jnp.int32).at[:e].set(dst)
    valid = (jnp.arange(e_pad) < e).astype(jnp.float32)
    rows = jnp.arange(e_pad)

    # 0/1 gather matrices Gd[e, i] = [dst[e] == i], Gs[e, i] = [src[e] == i];
    # scatter matrix is S = Gd^T (multiplicity-preserving sum over edges).
    gd = jnp.zeros((e_pad, n_pad), jnp.float32).at[rows, dst_p].set(valid)
    gs = jnp.zeros((e_pad, n_pad), jnp.float32).at[rows, src_p].set(valid)
    gd_bf = gd.astype(jnp.bfloat16)
    gs_bf = gs.astype(jnp.bfloat16)
    s_bf = gd.T.astype(jnp.bfloat16)

    # Stack the three layers' packed weights / biases.
    packed = [_pack_layer(params[l], cp) for l in range(3)]
    w_all = jnp.stack([w for w, _ in packed])       # (3, 2Cp, 2Cp) bf16
    b_all = jnp.stack([b for _, b in packed])       # (3, 1, 2Cp)   f32

    out = _l3cgconv_pallas(x_p, gd_bf, gs_bf, s_bf, w_all, b_all,
                           dropout_p=0.1, training=training, seed=seed)
    return out[:n, :c]


# ----------------------------------------------------------------------------
# Deterministic parameter init (CGConv(c, 0): lin_f, lin_s = Linear(2c, c))
# ----------------------------------------------------------------------------
def init_params(key, in_channels, out_channels):
    chans = [in_channels, out_channels, out_channels]
    keys = jax.random.split(key, 12)
    params = []
    for l, c in enumerate(chans):
        bound = 1.0 / float(2 * c) ** 0.5
        kf, kbf, ks, kbs = keys[4 * l:4 * l + 4]
        params.append(dict(
            wf=jax.random.uniform(kf, (2 * c, c), jnp.float32, -bound, bound),
            bf=jax.random.uniform(kbf, (c,), jnp.float32, -bound, bound),
            ws=jax.random.uniform(ks, (2 * c, c), jnp.float32, -bound, bound),
            bs=jax.random.uniform(kbs, (c,), jnp.float32, -bound, bound),
        ))
    return params


# ----------------------------------------------------------------------------
# Pure-JAX reference (eval mode, f32) for a correctness check
# ----------------------------------------------------------------------------
def _cgconv_ref(x, src, dst, p):
    z = jnp.concatenate([x[dst], x[src]], axis=-1)
    gate = jax.nn.sigmoid(z @ p["wf"] + p["bf"])
    core = jax.nn.softplus(z @ p["ws"] + p["bs"])
    m = gate * core
    agg = jnp.zeros_like(x).at[dst].add(m)
    return jnp.maximum(x + agg, 0.0)


def l3cgconv_ref(x, edge_index, params):
    src, dst = edge_index[0], edge_index[1]
    for l in range(3):
        x = _cgconv_ref(x, src, dst, params[l])   # eval: dropout = identity
    return x


if __name__ == "__main__":
    # CGConv preserves width, so in_channels == out_channels (as required for
    # the PyTorch module's layers to compose).
    N, C, E = 16, 8, 48

    key = jax.random.PRNGKey(0)
    k_x, k_src, k_dst, k_p = jax.random.split(key, 4)
    x = jax.random.normal(k_x, (N, C), jnp.float32)
    src = jax.random.randint(k_src, (E,), 0, N)
    dst = jax.random.randint(k_dst, (E,), 0, N)
    edge_index = jnp.stack([src, dst])            # (2, E), PyG convention

    params = init_params(k_p, C, C)

    out = l3cgconv_forward(x, edge_index, params, training=False)
    out = jax.block_until_ready(out)

    ref = l3cgconv_ref(x, edge_index, params)
    assert out.shape == (N, C), out.shape
    err = float(jnp.max(jnp.abs(out - ref)))
    # bf16 MXU inputs (f32 accumulation) -> slightly looser tolerance.
    assert jnp.allclose(out, ref, atol=5e-2, rtol=5e-2), err

    print("KERNEL_OK")
</pallas_src>

<mosaic_0001>
module attributes {stable_mosaic.version = 11 : i64} {
  func.func @_l3cgconv_kernel(%arg0: i32, %arg1: i32, %arg2: memref<1xi32, #tpu.memory_space<smem>>, %arg3: memref<16x128xf32, #tpu.memory_space<vmem>>, %arg4: memref<128x16xbf16, #tpu.memory_space<vmem>>, %arg5: memref<128x16xbf16, #tpu.memory_space<vmem>>, %arg6: memref<16x128xbf16, #tpu.memory_space<vmem>>, %arg7: memref<1x256x256xbf16, #tpu.memory_space<vmem>>, %arg8: memref<1x1x256xf32, #tpu.memory_space<vmem>>, %arg9: memref<16x128xf32, #tpu.memory_space<vmem>>, %arg10: memref<16x128xbf16, #tpu.memory_space<vmem>>) attributes {dimension_semantics = [#tpu.dimension_semantics<arbitrary>, #tpu.dimension_semantics<arbitrary>], iteration_bounds = array<i64: 3, 1>, scalar_prefetch = 0 : i64, scratch_operands = 1 : i64, tpu.core_type = #tpu.core_type<tc>, window_params = [{transform_indices = @transform_0, window_bounds = array<i64: 1>}, {pipeline_mode = #tpu.pipeline_mode<synchronous>, transform_indices = @transform_1, window_bounds = array<i64: 16, 128>}, {transform_indices = @transform_2, window_bounds = array<i64: 128, 16>}, {transform_indices = @transform_3, window_bounds = array<i64: 128, 16>}, {transform_indices = @transform_4, window_bounds = array<i64: 16, 128>}, {transform_indices = @transform_5, window_bounds = array<i64: 1, 256, 256>}, {transform_indices = @transform_6, window_bounds = array<i64: 1, 1, 256>}, {pipeline_mode = #tpu.pipeline_mode<synchronous>, transform_indices = @transform_7, window_bounds = array<i64: 16, 128>}]} {
    %c0_i32 = arith.constant 0 : i32
    %0 = arith.cmpi eq, %arg1, %c0_i32 : i32
    %1 = arith.extui %0 : i1 to i32
    %c0_i32_0 = arith.constant 0 : i32
    %2 = arith.cmpi ne, %1, %c0_i32_0 : i32
    scf.if %2 {
      %c0_i32_32 = arith.constant 0 : i32
      %50 = arith.cmpi eq, %arg0, %c0_i32_32 : i32
      %51 = arith.extui %50 : i1 to i32
      %c0_i32_33 = arith.constant 0 : i32
      %52 = arith.cmpi ne, %51, %c0_i32_33 : i32
      scf.if %52 {
        %c0_38 = arith.constant 0 : index
        %c0_39 = arith.constant 0 : index
        %56 = vector.load %arg3[%c0_38, %c0_39] : memref<16x128xf32, #tpu.memory_space<vmem>>, vector<16x128xf32>
        %c0_40 = arith.constant 0 : index
        %c0_41 = arith.constant 0 : index
        %57 = vector.load %arg9[%c0_40, %c0_41] : memref<16x128xf32, #tpu.memory_space<vmem>>, vector<16x128xf32>
        tpu.vector_store %arg9[%c0_40, %c0_41], %56 {strides = array<i32>} : memref<16x128xf32, #tpu.memory_space<vmem>>, vector<16x128xf32>,
      } else {
      }
      %c0_34 = arith.constant 0 : index
      %c0_35 = arith.constant 0 : index
      %53 = vector.load %arg9[%c0_34, %c0_35] : memref<16x128xf32, #tpu.memory_space<vmem>>, vector<16x128xf32>
      %54 = arith.truncf %53 : vector<16x128xf32> to vector<16x128xbf16>
      %c0_36 = arith.constant 0 : index
      %c0_37 = arith.constant 0 : index
      %55 = vector.load %arg10[%c0_36, %c0_37] : memref<16x128xbf16, #tpu.memory_space<vmem>>, vector<16x128xbf16>
      tpu.vector_store %arg10[%c0_36, %c0_37], %54 {strides = array<i32>} : memref<16x128xbf16, #tpu.memory_space<vmem>>, vector<16x128xbf16>,
    } else {
    }
    %c0 = arith.constant 0 : index
    %c0_1 = arith.constant 0 : index
    %3 = vector.load %arg10[%c0, %c0_1] : memref<16x128xbf16, #tpu.memory_space<vmem>>, vector<16x128xbf16>
    %c0_2 = arith.constant 0 : index
    %c0_3 = arith.constant 0 : index
    %4 = vector.load %arg4[%c0_2, %c0_3] : memref<128x16xbf16, #tpu.memory_space<vmem>>, vector<128x16xbf16>
    %cst = arith.constant dense<0.000000e+00> : vector<128x128xf32>
    %5 = tpu.matmul %4, %3, %cst {dimension_numbers = #tpu.dot_dimension_numbers<[1], [0], [0], [1], [0, 0, 1, 1], [], []>} : vector<128x16xbf16>, vector<16x128xbf16>, vector<128x128xf32> -> vector<128x128xf32>
    %6 = arith.truncf %5 : vector<128x128xf32> to vector<128x128xbf16>
    %c0_4 = arith.constant 0 : index
    %c0_5 = arith.constant 0 : index
    %7 = vector.load %arg5[%c0_4, %c0_5] : memref<128x16xbf16, #tpu.memory_space<vmem>>, vector<128x16xbf16>
    %cst_6 = arith.constant dense<0.000000e+00> : vector<128x128xf32>
    %8 = tpu.matmul %7, %3, %cst_6 {dimension_numbers = #tpu.dot_dimension_numbers<[1], [0], [0], [1], [0, 0, 1, 1], [], []>} : vector<128x16xbf16>, vector<16x128xbf16>, vector<128x128xf32> -> vector<128x128xf32>
    %9 = arith.truncf %8 : vector<128x128xf32> to vector<128x128xbf16>
    %c0_7 = arith.constant 0 : index
    %c0_8 = arith.constant 0 : index
    %c0_9 = arith.constant 0 : index
    %10 = vector.load %arg7[%c0_7, %c0_8, %c0_9] : memref<1x256x256xbf16, #tpu.memory_space<vmem>>, vector<1x128x256xbf16>
    %11 = vector.shape_cast %10 : vector<1x128x256xbf16> to vector<128x256xbf16>
    %cst_10 = arith.constant dense<0.000000e+00> : vector<128x256xf32>
    %12 = tpu.matmul %6, %11, %cst_10 {dimension_numbers = #tpu.dot_dimension_numbers<[1], [0], [0], [1], [0, 0, 1, 1], [], []>} : vector<128x128xbf16>, vector<128x256xbf16>, vector<128x256xf32> -> vector<128x256xf32>
    %c0_11 = arith.constant 0 : index
    %c128 = arith.constant 128 : index
    %c0_12 = arith.constant 0 : index
    %13 = vector.load %arg7[%c0_11, %c128, %c0_12] : memref<1x256x256xbf16, #tpu.memory_space<vmem>>, vector<1x128x256xbf16>
    %14 = vector.shape_cast %13 : vector<1x128x256xbf16> to vector<128x256xbf16>
    %cst_13 = arith.constant dense<0.000000e+00> : vector<128x256xf32>
    %15 = tpu.matmul %9, %14, %cst_13 {dimension_numbers = #tpu.dot_dimension_numbers<[1], [0], [0], [1], [0, 0, 1, 1], [], []>} : vector<128x128xbf16>, vector<128x256xbf16>, vector<128x256xf32> -> vector<128x256xf32>
    %16 = arith.addf %12, %15 : vector<128x256xf32>
    %c0_14 = arith.constant 0 : index
    %c0_15 = arith.constant 0 : index
    %c0_16 = arith.constant 0 : index
    %17 = vector.load %arg8[%c0_14, %c0_15, %c0_16] : memref<1x1x256xf32, #tpu.memory_space<vmem>>, vector<1x1x256xf32>
    %18 = vector.shape_cast %17 : vector<1x1x256xf32> to vector<1x256xf32>
    %19 = vector.broadcast %18 : vector<1x256xf32> to vector<128x256xf32>
    %20 = arith.addf %16, %19 : vector<128x256xf32>
    %21 = vector.extract_strided_slice %20 {offsets = [0, 0], sizes = [128, 128], strides = [1, 1]} : vector<128x256xf32> to vector<128x128xf32>
    %22 = vector.extract_strided_slice %20 {offsets = [0, 128], sizes = [128, 128], strides = [1, 1]} : vector<128x256xf32> to vector<128x128xf32>
    %cst_17 = arith.constant 0.000000e+00 : f32
    %23 = vector.broadcast %cst_17 : f32 to vector<128x128xf32>
    %24 = arith.subf %23, %21 : vector<128x128xf32>
    %25 = math.exp %24 : vector<128x128xf32>
    %cst_18 = arith.constant 1.000000e+00 : f32
    %26 = vector.broadcast %cst_18 : f32 to vector<128x128xf32>
    %27 = arith.addf %26, %25 : vector<128x128xf32>
    %cst_19 = arith.constant 1.000000e+00 : f32
    %28 = vector.broadcast %cst_19 : f32 to vector<128x128xf32>
    %29 = arith.divf %28, %27 : vector<128x128xf32>
    %cst_20 = arith.constant 0.000000e+00 : f32
    %30 = vector.broadcast %cst_20 : f32 to vector<128x128xf32>
    %31 = arith.maximumf %22, %30 : vector<128x128xf32>
    %32 = math.absf %22 : vector<128x128xf32>
    %cst_21 = arith.constant 0.000000e+00 : f32
    %33 = vector.broadcast %cst_21 : f32 to vector<128x128xf32>
    %34 = arith.subf %33, %32 : vector<128x128xf32>
    %35 = math.exp %34 : vector<128x128xf32>
    %cst_22 = arith.constant 1.000000e+00 : f32
    %36 = vector.broadcast %cst_22 : f32 to vector<128x128xf32>
    %37 = arith.addf %36, %35 : vector<128x128xf32>
    %38 = math.log %37 : vector<128x128xf32>
    %39 = arith.addf %31, %38 : vector<128x128xf32>
    %40 = arith.mulf %29, %39 : vector<128x128xf32>
    %41 = arith.truncf %40 : vector<128x128xf32> to vector<128x128xbf16>
    %c0_23 = arith.constant 0 : index
    %c0_24 = arith.constant 0 : index
    %42 = vector.load %arg9[%c0_23, %c0_24] : memref<16x128xf32, #tpu.memory_space<vmem>>, vector<16x128xf32>
    %c0_25 = arith.constant 0 : index
    %c0_26 = arith.constant 0 : index
    %43 = vector.load %arg6[%c0_25, %c0_26] : memref<16x128xbf16, #tpu.memory_space<vmem>>, vector<16x128xbf16>
    %cst_27 = arith.constant dense<0.000000e+00> : vector<16x128xf32>
    %44 = tpu.matmul %43, %41, %cst_27 {dimension_numbers = #tpu.dot_dimension_numbers<[1], [0], [0], [1], [0, 0, 1, 1], [], []>} : vector<16x128xbf16>, vector<128x128xbf16>, vector<16x128xf32> -> vector<16x128xf32>
    %45 = arith.addf %42, %44 : vector<16x128xf32>
    %c0_28 = arith.constant 0 : index
    %c0_29 = arith.constant 0 : index
    %46 = vector.load %arg9[%c0_28, %c0_29] : memref<16x128xf32, #tpu.memory_space<vmem>>, vector<16x128xf32>
    tpu.vector_store %arg9[%c0_28, %c0_29], %45 {strides = array<i32>} : memref<16x128xf32, #tpu.memory_space<vmem>>, vector<16x128xf32>,
    %c0_i32_30 = arith.constant 0 : i32
    %47 = arith.cmpi eq, %arg1, %c0_i32_30 : i32
    %48 = arith.extui %47 : i1 to i32
    %c0_i32_31 = arith.constant 0 : i32
    %49 = arith.cmpi ne, %48, %c0_i32_31 : i32
    scf.if %49 {
      %c0_32 = arith.constant 0 : index
      %c0_33 = arith.constant 0 : index
      %50 = vector.load %arg9[%c0_32, %c0_33] : memref<16x128xf32, #tpu.memory_space<vmem>>, vector<16x128xf32>
      %cst_34 = arith.constant 0.000000e+00 : f32
      %51 = vector.broadcast %cst_34 : f32 to vector<16x128xf32>
      %52 = arith.maximumf %50, %51 : vector<16x128xf32>
      %c0_35 = arith.constant 0 : index
      %c0_36 = arith.constant 0 : index
      %53 = vector.load %arg9[%c0_35, %c0_36] : memref<16x128xf32, #tpu.memory_space<vmem>>, vector<16x128xf32>
      tpu.vector_store %arg9[%c0_35, %c0_36], %52 {strides = array<i32>} : memref<16x128xf32, #tpu.memory_space<vmem>>, vector<16x128xf32>,
    } else {
    }
    return
  }
  func.func @transform_0(%arg0: i32, %arg1: i32) -> i32 {
    %c0_i32 = arith.constant 0 : i32
    %c0_i32_0 = arith.constant 0 : i32
    return %c0_i32 : i32
  }
  func.func @transform_1(%arg0: i32, %arg1: i32) -> (i32, i32) {
    %c0_i32 = arith.constant 0 : i32
    %c0_i32_0 = arith.constant 0 : i32
    %c0_i32_1 = arith.constant 0 : i32
    return %c0_i32, %c0_i32_0 : i32, i32
  }
  func.func @transform_2(%arg0: i32, %arg1: i32) -> (i32, i32) {
    %c0_i32 = arith.constant 0 : i32
    %c0_i32_0 = arith.constant 0 : i32
    return %arg1, %c0_i32 : i32, i32
  }
  func.func @transform_3(%arg0: i32, %arg1: i32) -> (i32, i32) {
    %c0_i32 = arith.constant 0 : i32
    %c0_i32_0 = arith.constant 0 : i32
    return %arg1, %c0_i32 : i32, i32
  }
  func.func @transform_4(%arg0: i32, %arg1: i32) -> (i32, i32) {
    %c0_i32 = arith.constant 0 : i32
    %c0_i32_0 = arith.constant 0 : i32
    return %c0_i32, %arg1 : i32, i32
  }
  func.func @transform_5(%arg0: i32, %arg1: i32) -> (i32, i32, i32) {
    %c0_i32 = arith.constant 0 : i32
    %c0_i32_0 = arith.constant 0 : i32
    %c0_i32_1 = arith.constant 0 : i32
    return %arg0, %c0_i32, %c0_i32_0 : i32, i32, i32
  }
  func.func @transform_6(%arg0: i32, %arg1: i32) -> (i32, i32, i32) {
    %c0_i32 = arith.constant 0 : i32
    %c0_i32_0 = arith.constant 0 : i32
    %c0_i32_1 = arith.constant 0 : i32
    return %arg0, %c0_i32, %c0_i32_0 : i32, i32, i32
  }
  func.func @transform_7(%arg0: i32, %arg1: i32) -> (i32, i32) {
    %c0_i32 = arith.constant 0 : i32
    %c0_i32_0 = arith.constant 0 : i32
    %c0_i32_1 = arith.constant 0 : i32
    return %c0_i32, %c0_i32_0 : i32, i32
  }
}

</mosaic_0001>

<bundles_post_ra>
// kernel: tpu_custom_call.1
= control target key start
LH: loop header
LB: loop body
LE: loop exit
PB: predicated region body
PF: predicated region fallthrough
CT: control target
= control target key end

     0   :  { %13 = vsyncpa [#allocation5], 0  ;;  %s2746_s0 = inlined_call_operand.<no memory space> [shape: s32[1], index: 0, kind: input, shape index: {}]   ;;  %s2747_s1 = inlined_call_operand.vmem [shape: f32[16,128], index: 1, kind: input, shape index: {}]   ;;  %s2748_s2 = inlined_call_operand.vmem [shape: bf16[128,16], index: 2, kind: input, shape index: {}]   ;;  %s2749_s3 = inlined_call_operand.vmem [shape: bf16[128,16], index: 3, kind: input, shape index: {}]   ;;  %s2750_s4 = inlined_call_operand.vmem [shape: bf16[16,128], index: 4, kind: input, shape index: {}]   ;;  %s2751_s5 = inlined_call_operand.hbm [shape: bf16[3,256,256], index: 5, kind: input, shape index: {}]   ;;  %s2752_s6 = inlined_call_operand.vmem [shape: f32[3,1,256], index: 6, kind: input, shape index: {}]   ;;  %s2753_s7 = inlined_call_operand.hbm [shape: f32[16,128], index: 7, kind: output, shape index: {}]  }
   0x1   :  { %15 = vsyncpa [#allocation5 + $0x1], 0 }
   0x2   :  { %16 = vsyncpa [#allocation6], 0  ;;  %s2291_s23 = smov 0   ;;  %s2293_s24 = smov 0  }
   0x3   :  { %s2295_s25 = smov 0   ;;  %s2297_s26 = smov 0  }
   0x4   :  { %s2299_s27 = smov 0   ;;  %s2301_s28 = smov 0  }
   0x5 LB: > { %s1695_s29 = sadd.s32 4294967295, %s2240_s28   ;;  %s34_s30 = sadd.s32 1, %s2236_s27  ;;  %s2240_s28 = sphi %s2301_s28, %s22_s28   ;;  %s2236_s27 = sphi %s2299_s27, %s2762_s27   ;;  %s2232_s26 = sphi %s2297_s26, %s2761_s26   ;;  %s2228_s25 = sphi %s2295_s25, %s2760_s25   ;;  %s2224_s24 = sphi %s2293_s24, %s2759_s24   ;;  %s2220_s23 = sphi %s2291_s23, %s2758_s23  }
   0x6   : > { %p36_p0 = scmp.ge.s32.totalorder %s34_s30, 3  ;;  %s161_s8 = sadd.s32 1, %s2228_s25 }
   0x7   : > { %p168_p1 = scmp.ne.s32.totalorder %s2228_s25, %s2224_s24  ;;  %p169_p2 = scmp.eq.s32.totalorder %s2240_s28, 0 }
   0x8   : > { %s2764_s30 = smov (%p36_p0, %s34_s30), 0  ;;  %p174_p4 = scmp.ne.s32.totalorder %s2224_s24, %s2220_s23 }
   0x9   : > { %p2327_p3 = por %p169_p2, %p168_p1  ;;  %s158_s10 = ssub.s32 %s2236_s27, %s2764_s30 }
   0xa   : > { %p175_p5 = scmp.eq.s32.totalorder %s1695_s29, 0  ;;  %p159_p6 = scmp.eq.s32.totalorder %s158_s10, 0 }
   0xb   : > { %p1881_p8 = scmp.lt.s32.totalorder %s2240_s28, 3  ;;  %s276_s13 = sand.u32 1, %s2228_s25  }
   0xc   : > { %p2336_p7 = por %p175_p5, %p174_p4  ;;  %s1780_s14 = sshll.u32 %s2236_s27, 12 }
   0xd   : > { %s2342_s12 = scalar_select %p159_p6, %s2228_s25, %s161_s8  }
   0xe   : > { %s1701_s15 = sshll.u32 %s276_s13, 8  ;;  %s286_s18 = scalar_lea.hbm %s2751_s5, %s1780_s14 }
   0xf   : > { %s280_s19 = scalar_lea.vmem [#allocation4], %s1701_s15  ;;  %p2351_p9 = pnand %p1881_p8, %p2327_p3 }
  0x10   : > { %s287_s20 = sshll.u32 %s280_s19, 4  ;;  %s277_s22 = scalar_lea.sflag [#allocation5], %s276_s13  ;;  %s288_s20 = int_to_ptr.vmem [resolvable:$true] %s287_s20 }
  0x11   : > { %p2136_p10 = pneg %p2351_p9  ;;  %s2147_s0 = scalar_lea.vmem %s288_s20, 4096 }
  0x12   : > { %p2148_p11 = scmp.ne.s32.totalorder %s288_s20, %s2147_s0  ;;  %s2242_s23 = smov [#allocation4]  }
  0x13   : > { %s2152_s8 = sshll.u32 %s2242_s23, 4  ;;  %s2153_s8 = int_to_ptr.vmem [resolvable:$false] %s2152_s8 }
  0x14   : > { %p2150_p12 = pnand %p2148_p11, %p2136_p10  ;;  %s2154_s10 = scalar_lea.vmem %s2153_s8, 8192 }
  0x15   : > { %p2155_p0 = scmp.lt.s32.totalorder %s288_s20, %s2153_s8  ;;  %p2156_p1 = scmp.lt.s32.totalorder %s2154_s10, %s2147_s0 }
  0x16   : > { %p2151_p13 = pneg %p2150_p12 }
  0x17   : > { %p2157_p2 = por %p2156_p1, %p2155_p0 }
  0x19   : > { %p2158_p3 = pnand %p2157_p2, %p2151_p13 }
  0x1b   : > { %2161 = shalt.err (!%p2158_p3)
}
  0x1c   : > { %s2243_s9 = smov 128   ;;  %s2244_s13 = smov 8  }
  0x1d   : > { %1880 = dma.hbm_to_vmem [thread:$0]  (!%p2351_p9), %s286_s18, 4096, %s288_s20, %s277_s22, %s2243_s9, %s2243_s9, %s2244_s13  }
  0x1e   : > { %p1704_p4 = scmp.ge.s32.totalorder %s2240_s28, 1  ;;  %p302_p5 = scmp.lt.s32.totalorder %s2240_s28, 4 }
  0x20   : > { %p303_p6 = pnand %p1704_p4, %p302_p5 }
  0x21   : > { %s308_s14 = sand.u32 (!%p303_p6), 1, %s2224_s24  }
  0x22   : > { %306 = sbr.rel (%p303_p6) target bundleno = 815 (0x32f), region = 48  ;;  %s1705_s15 = sshll.u32 (!%p303_p6), %s308_s14, 8 }
  0x23   : > { %s309_s16 = scalar_lea.sflag (!%p303_p6), [#allocation5], %s308_s14  ;;  %s2362_s17 = scalar_lea.vmem (!%p303_p6), [#allocation4], %s1705_s15 }
  0x27   : > { %2211 = dma.done.wait (%p2336_p7), %s309_s16, 4096  }
  0x28   : > { %2213 = vsyncadd (%p2336_p7), %s309_s16, 4294963200  ;;  %p372_p8 = scmp.lt.s32.totalorder %s2232_s26, 2  ;;  %p1707_p9 = scmp.ne.s32.totalorder %s2232_s26, 0 }
  0x2a   : > { %s373_s18 = scalar_select %p372_p8, %s2232_s26, 2 }
  0x2b   : > { %384 = sbr.rel (%p1707_p9) target bundleno = 50 (0x32), region = 60 }
  0x2c   : > { %s1706_s19 = sshll.u32 %s373_s18, 1 }
  0x2d   : > { %s2373_s22 = scalar_lea.vmem %s2752_s6, %s1706_s19 }
  0x30   : > { %v385_v0 = vld [vmem:[%s2747_s1] sm:$0xff]  ;;  %v386_v1 = vld [vmem:[%s2747_s1 + $0x8] sm:$0xff] }
  0x31   : > { %387 = vst [vmem:[#allocation7] sm:$0xff] %v385_v0  ;;  %388 = vst [vmem:[#allocation7 + $0x8] sm:$0xff] %v386_v1 }
  0x32 PF: > { %vm465_vm0 = vcmask 130048   ;;  %v1941_v5 = vld [vmem:[%s2748_s2] sm:$0xff]   ;;  %v1943_v8 = vld [vmem:[%s2748_s2 + $0x8] sm:$0xff]   ;;  %v1945_v10 = vld [vmem:[%s2748_s2 + $0x10] sm:$0xff]   ;;  %v2245_v54 = vmov 0   ;;  %vm2247_vm1 = vmmov 0  }
  0x33   : > { %v1942_v6 = vld [vmem:[%s2749_s3] sm:$0xff]   ;;  %1817 = vmatprep.mubr.msk.bf16.mxu0 %vm465_vm0, %v1941_v5  ;;  %v1944_v9 = vld [vmem:[%s2749_s3 + $0x8] sm:$0xff]   ;;  %v1946_v11 = vld [vmem:[%s2749_s3 + $0x10] sm:$0xff]   ;;  %s2248_s26 = smov [#allocation7]   ;;  %p2713_p7 = scmp.eq.s32.totalorder %s1695_s29, 2 }
  0x34   : > { %1835 = vmatprep.mubr.msk.bf16.mxu1 %vm465_vm0, %v1942_v6  ;;  %v1947_v12 = vld [vmem:[%s2748_s2 + $0x18] sm:$0xff]   ;;  %v1949_v16 = vld [vmem:[%s2748_s2 + $0x20] sm:$0xff]   ;;  %v1965_v20 = vld [vmem:[%s2362_s17 + $0xe4] ss:$8 sps:$4 sm:$0xff]   ;;  %s1576_s13 = sshll.u32 %s2248_s26, 4  ;;  %s1577_s13 = int_to_ptr.vmem [resolvable:$true] %s1576_s13 }
  0x35   : > { %v1948_v13 = vld [vmem:[%s2749_s3 + $0x18] sm:$0xff]   ;;  %v1950_v19 = vld [vmem:[%s2749_s3 + $0x20] sm:$0xff]   ;;  %v1963_v21 = vld [vmem:[%s2362_s17 + $0xe0] ss:$8 sps:$4 sm:$0xff]   ;;  %s2162_s15 = scalar_lea.vmem %s1577_s13, 256  ;;  %p2169_p13 = scmp.lt.s32.totalorder %s1577_s13, %s1577_s13 }
  0x36   : > { %v1957_v14 = vld [vmem:[%s2362_s17 + $0xf0] ss:$8 sps:$4 sm:$0xff]   ;;  %v1959_v15 = vld [vmem:[%s2362_s17 + $0xf4] ss:$8 sps:$4 sm:$0xff]   ;;  %v1968_v22 = vld [vmem:[%s2362_s17 + $0x64] ss:$8 sps:$4 sm:$0xff]   ;;  %p2163_p10 = scmp.ne.s32.totalorder %s1577_s13, %s2162_s15  ;;  %p2170_p0 = scmp.lt.s32.totalorder %s2162_s15, %s2162_s15 }
  0x37   : > { %v1960_v17 = vld [vmem:[%s2362_s17 + $0x70] ss:$8 sps:$4 sm:$0xff]   ;;  %v1962_v18 = vld [vmem:[%s2362_s17 + $0x74] ss:$8 sps:$4 sm:$0xff]   ;;  %v1966_v23 = vld [vmem:[%s2362_s17 + $0x60] ss:$8 sps:$4 sm:$0xff]  }
  0x38   : > { %v389_v2 = vld [vmem:[#allocation7] sm:$0xff]  ;;  %v390_v3 = vld [vmem:[#allocation7 + $0x8] sm:$0xff]  ;;  %v1971_v24 = vld [vmem:[%s2362_s17 + $0xd4] ss:$8 sps:$4 sm:$0xff]   ;;  %p2164_p11 = pnand %p2163_p10, %p2713_p7  ;;  %p2171_p1 = por %p2170_p0, %p2169_p13 }
  0x39   : > { %v1786_v4 = vpack.c.bf16 %v390_v3, %v389_v2  ;;  %v1974_v25 = vld [vmem:[%s2362_s17 + $0x54] ss:$8 sps:$4 sm:$0xff]   ;;  %v1951_v26 = vld [vmem:[%s2748_s2 + $0x28] sm:$0xff]   ;;  %v1969_v28 = vld [vmem:[%s2362_s17 + $0xd0] ss:$8 sps:$4 sm:$0xff]  }
  0x3a   : > { %v1952_v27 = vld [vmem:[%s2749_s3 + $0x28] sm:$0xff]   ;;  %v1972_v29 = vld [vmem:[%s2362_s17 + $0x50] ss:$8 sps:$4 sm:$0xff]   ;;  %v1953_v31 = vld [vmem:[%s2748_s2 + $0x30] sm:$0xff]   ;;  %p2165_p12 = pneg %p2164_p11 }
  0x3b   : > { %1787 = vst [vmem:[#allocation2] sm:$0xff] %v1786_v4   ;;  %v1977_v30 = vld [vmem:[%s2362_s17 + $0xc4] ss:$8 sps:$4 sm:$0xff]   ;;  %v1975_v33 = vld [vmem:[%s2362_s17 + $0xc0] ss:$8 sps:$4 sm:$0xff]   ;;  %v1955_v41 = vld [vmem:[%s2748_s2 + $0x38] sm:$0xff]  }
  0x3c   : > { %v1954_v32 = vld [vmem:[%s2749_s3 + $0x30] sm:$0xff]   ;;  %v1983_v36 = vld [vmem:[%s2362_s17 + $0xb4] ss:$8 sps:$4 sm:$0xff]   ;;  %v1981_v37 = vld [vmem:[%s2362_s17 + $0xb0] ss:$8 sps:$4 sm:$0xff]   ;;  %p2172_p2 = pnand %p2171_p1, %p2165_p12 }
  0x3d   : > { %v1978_v34 = vld [vmem:[%s2362_s17 + $0x40] ss:$8 sps:$4 sm:$0xff]   ;;  %v1980_v35 = vld [vmem:[%s2362_s17 + $0x44] ss:$8 sps:$4 sm:$0xff]   ;;  %v1986_v38 = vld [vmem:[%s2362_s17 + $0x34] ss:$8 sps:$4 sm:$0xff]  }
  0x3e   : > { %v1984_v39 = vld [vmem:[%s2362_s17 + $0x30] ss:$8 sps:$4 sm:$0xff]   ;;  %v1989_v40 = vld [vmem:[%s2362_s17 + $0xa4] ss:$8 sps:$4 sm:$0xff]   ;;  %v1987_v44 = vld [vmem:[%s2362_s17 + $0xa0] ss:$8 sps:$4 sm:$0xff]  }
  0x3f   : > { %v1956_v42 = vld [vmem:[%s2749_s3 + $0x38] sm:$0xff]   ;;  %v1992_v43 = vld [vmem:[%s2362_s17 + $0x24] ss:$8 sps:$4 sm:$0xff]   ;;  %v1990_v45 = vld [vmem:[%s2362_s17 + $0x20] ss:$8 sps:$4 sm:$0xff]  }
  0x40   : > { %v1995_v46 = vld [vmem:[%s2362_s17 + $0x94] ss:$8 sps:$4 sm:$0xff]   ;;  %v1993_v48 = vld [vmem:[%s2362_s17 + $0x90] ss:$8 sps:$4 sm:$0xff]   ;;  %v2001_v50 = vld [vmem:[%s2362_s17 + $0x84] ss:$8 sps:$4 sm:$0xff]  }
  0x41   : > { %v1998_v47 = vld [vmem:[%s2362_s17 + $0x14] ss:$8 sps:$4 sm:$0xff]   ;;  %v1996_v49 = vld [vmem:[%s2362_s17 + $0x10] ss:$8 sps:$4 sm:$0xff]   ;;  %v2004_v51 = vld [vmem:[%s2362_s17 + $0x4] ss:$8 sps:$4 sm:$0xff]  }
  0x42   : > { %v1940_v7 = vld [vmem:[#allocation2] sm:$0xff]   ;;  %v1999_v52 = vld [vmem:[%s2362_s17 + $0x80] ss:$8 sps:$4 sm:$0xff]  }
  0x43   : > { %1815 = vmatprep.subr.bf16.mxu0 %v1940_v7  ;;  %1833 = vmatprep.subr.bf16.mxu1 %v1940_v7  ;;  %v2002_v53 = vld [vmem:[%s2362_s17] ss:$8 sps:$4 sm:$0xff]  }
  0x44   : > { %1816 = vmatpush3.bf16.msra.mxu0 %v1940_v7  ;;  %1834 = vmatpush3.bf16.msra.mxu1 %v1940_v7 }
  0x45   : > { %892 = vmatprep.subr.bf16.mxu0 %v1959_v15  ;;  %1085 = vmatprep.subr.bf16.mxu1 %v1962_v18 }
  0x47   : > { %1818 = vmatmul.mubr.msk.bf16.vlgmr.msra.gmra.mxu0 %vm465_vm0, %v1943_v8  ;;  %1836 = vmatmul.mubr.msk.bf16.vlgmr.msra.gmra.mxu1 %vm465_vm0, %v1944_v9 }
  0x48   : > { %1821 = vmatprep.mubr.msk.bf16.mxu0 %vm465_vm0, %v1945_v10  ;;  %1839 = vmatprep.mubr.msk.bf16.mxu1 %vm465_vm0, %v1946_v11 }
  0x49   : > { %893 = vmatpush1.bf16.msra.mxu0 %v1957_v14  ;;  %1086 = vmatpush1.bf16.msra.mxu1 %v1960_v17 }
  0x4a   : > { %894 = vmatprep.subr.bf16.mxu0 %v1965_v20  ;;  %1087 = vmatprep.subr.bf16.mxu1 %v1968_v22 }
  0x4d   : > { %895 = vmatpush1.bf16.msra.mxu0 %v1963_v21  ;;  %1088 = vmatpush1.bf16.msra.mxu1 %v1966_v23 }
  0x4e   : > { %896 = vmatprep.subr.bf16.mxu0 %v1971_v24  ;;  %1089 = vmatprep.subr.bf16.mxu1 %v1974_v25 }
  0x4f   : > { %1822 = vmatmul.mubr.msk.bf16.gmra.mxu0 %vm465_vm0, %v1947_v12  ;;  %1840 = vmatmul.mubr.msk.bf16.gmra.mxu1 %vm465_vm0, %v1948_v13 }
  0x50   : > { %1825 = vmatprep.mubr.msk.bf16.mxu0 %vm465_vm0, %v1949_v16  ;;  %1843 = vmatprep.mubr.msk.bf16.mxu1 %vm465_vm0, %v1950_v19 }
  0x51   : > { %897 = vmatpush1.bf16.msra.mxu0 %v1969_v28  ;;  %1090 = vmatpush1.bf16.msra.mxu1 %v1972_v29 }
  0x52   : > { %898 = vmatprep.subr.bf16.mxu0 %v1977_v30  ;;  %1091 = vmatprep.subr.bf16.mxu1 %v1980_v35 }
  0x55   : > { %899 = vmatpush1.bf16.msra.mxu0 %v1975_v33  ;;  %1092 = vmatpush1.bf16.msra.mxu1 %v1978_v34 }
  0x56   : > { %900 = vmatprep.subr.bf16.mxu0 %v1983_v36  ;;  %1093 = vmatprep.subr.bf16.mxu1 %v1986_v38 }
  0x57   : > { %1826 = vmatmul.mubr.msk.bf16.gmra.mxu0 %vm465_vm0, %v1951_v26  ;;  %1844 = vmatmul.mubr.msk.bf16.gmra.mxu1 %vm465_vm0, %v1952_v27 }
  0x58   : > { %1829 = vmatprep.mubr.msk.bf16.mxu0 %vm465_vm0, %v1953_v31  ;;  %1847 = vmatprep.mubr.msk.bf16.mxu1 %vm465_vm0, %v1954_v32 }
  0x59   : > { %901 = vmatpush1.bf16.msra.mxu0 %v1981_v37  ;;  %1094 = vmatpush1.bf16.msra.mxu1 %v1984_v39  ;;  %v1200_v39 = vlaneseq }
  0x5a   : > { %902 = vmatprep.subr.bf16.mxu0 %v1989_v40  ;;  %1095 = vmatprep.subr.bf16.mxu1 %v1992_v43  ;;  %v2246_v40 = vmov 0.0   ;;  %v1198_v43 = vld [vmem:[%s2373_s22] sm:$0x3] }
  0x5d   : > { %903 = vmatpush1.bf16.msra.mxu0 %v1987_v44  ;;  %1096 = vmatpush1.bf16.msra.mxu1 %v1990_v45 }
  0x5e   : > { %904 = vmatprep.subr.bf16.mxu0 %v1995_v46  ;;  %1097 = vmatprep.subr.bf16.mxu1 %v1998_v47 }
  0x5f   : > { %1830 = vmatmul.mubr.msk.bf16.gmra.mxu0 %vm465_vm0, %v1955_v41  ;;  %1848 = vmatmul.mubr.msk.bf16.gmra.mxu1 %vm465_vm0, %v1956_v42  ;;  %v1201_v41 = vshrl.u32 %v1200_v39, 7 }
  0x60   : > { %924 = vmatprep.mubr.bf16.mxu0 %v2245_v54  ;;  %1117 = vmatprep.mubr.bf16.mxu1 %v2245_v54 }
  0x61   : > { %905 = vmatpush1.bf16.msra.mxu0 %v1993_v48  ;;  %1098 = vmatpush1.bf16.msra.mxu1 %v1996_v49  ;;  %v1202_v42 = vsub.s32 0, %v1201_v41  ;;  %v1206_v44 = vsub.s32 1, %v1201_v41 }
  0x62   : > { %906 = vmatprep.subr.bf16.mxu0 %v2001_v50  ;;  %1099 = vmatprep.subr.bf16.mxu1 %v2004_v51 }
  0x63   : > { %v2496_v45 = vrot.slane %v1198_v43, %v1202_v42  ;;  %v2498_v49 = vrot.slane %v1198_v43, %v1206_v44 }
  0x65   : > { %907 = vmatpush1.bf16.msra.mxu0 %v1999_v52  ;;  %1100 = vmatpush1.bf16.msra.mxu1 %v2002_v53 }
  0x66   : > { %1851 = vmatprep.subr.bf16.mxu0 %v2246_v40 }
 0x107   : > { %v1819_v55 = vpop.f32.mrf.mxu0  ;;  %v1837_v56 = vpop.f32.mrf.mxu1 }
 0x109   : > { %v524_v57 = vpop.f32.mrf.mxu0  ;;  %v709_v58 = vpop.f32.mrf.mxu1 }
 0x10b   : > { %v1820_v59 = vpop.f32.mrf.mxu0  ;;  %v1838_v60 = vpop.f32.mrf.mxu1 }
 0x10c   : > { %v588_v5 = vpack.c.bf16 %v1820_v59, %v1819_v55  ;;  %v773_v6 = vpack.c.bf16 %v1838_v60, %v1837_v56 }
 0x10d   : > { %v527_v61 = vpop.f32.mrf.mxu0  ;;  %v712_v62 = vpop.f32.mrf.mxu1 }
 0x10e   : > { %v587_v63 = vpack.c.bf16 %v527_v61, %v524_v57  ;;  %v772_v0 = vpack.c.bf16 %v712_v62, %v709_v58 }
 0x10f   : > { %v1823_v1 = vpop.f32.mrf.mxu0  ;;  %v1841_v2 = vpop.f32.mrf.mxu1 }
 0x110   : > { %925 = vmatmul.mubr.bf16.vlgmr.msra.gmra.mxu0 %v772_v0  ;;  %1118 = vmatmul.mubr.bf16.vlgmr.msra.gmra.mxu1 %v587_v63 }
 0x111   : > { %934 = vmatprep.mubr.bf16.mxu0 %v2245_v54  ;;  %1127 = vmatprep.mubr.bf16.mxu1 %v2245_v54  ;;  %v540_v3 = vpop.f32.mrf.mxu0  ;;  %v725_v4 = vpop.f32.mrf.mxu1 }
 0x113   : > { %v1824_v7 = vpop.f32.mrf.mxu0  ;;  %v1842_v8 = vpop.f32.mrf.mxu1 }
 0x114   : > { %v590_v17 = vpack.c.bf16 %v1824_v7, %v1823_v1  ;;  %v775_v18 = vpack.c.bf16 %v1842_v8, %v1841_v2 }
 0x115   : > { %v543_v9 = vpop.f32.mrf.mxu0  ;;  %v728_v10 = vpop.f32.mrf.mxu1 }
 0x116   : > { %v589_v11 = vpack.c.bf16 %v543_v9, %v540_v3  ;;  %v774_v12 = vpack.c.bf16 %v728_v10, %v725_v4 }
 0x117   : > { %v1827_v13 = vpop.f32.mrf.mxu0  ;;  %v1845_v14 = vpop.f32.mrf.mxu1 }
 0x118   : > { %935 = vmatmul.mubr.bf16.gmra.mxu0 %v773_v6  ;;  %1128 = vmatmul.mubr.bf16.gmra.mxu1 %v588_v5 }
 0x119   : > { %944 = vmatprep.mubr.bf16.mxu0 %v2245_v54  ;;  %1137 = vmatprep.mubr.bf16.mxu1 %v2245_v54  ;;  %v556_v15 = vpop.f32.mrf.mxu0  ;;  %v741_v16 = vpop.f32.mrf.mxu1 }
 0x11b   : > { %v1828_v19 = vpop.f32.mrf.mxu0  ;;  %v1846_v20 = vpop.f32.mrf.mxu1 }
 0x11c   : > { %v592_v29 = vpack.c.bf16 %v1828_v19, %v1827_v13  ;;  %v777_v30 = vpack.c.bf16 %v1846_v20, %v1845_v14 }
 0x11d   : > { %v559_v21 = vpop.f32.mrf.mxu0  ;;  %v744_v22 = vpop.f32.mrf.mxu1 }
 0x11e   : > { %v591_v23 = vpack.c.bf16 %v559_v21, %v556_v15  ;;  %v776_v24 = vpack.c.bf16 %v744_v22, %v741_v16 }
 0x11f   : > { %v1831_v25 = vpop.f32.mrf.mxu0  ;;  %v1849_v26 = vpop.f32.mrf.mxu1 }
 0x120   : > { %945 = vmatmul.mubr.bf16.gmra.mxu0 %v774_v12  ;;  %1138 = vmatmul.mubr.bf16.gmra.mxu1 %v589_v11 }
 0x121   : > { %954 = vmatprep.mubr.bf16.mxu0 %v2245_v54  ;;  %1147 = vmatprep.mubr.bf16.mxu1 %v2245_v54  ;;  %v572_v27 = vpop.f32.mrf.mxu0  ;;  %v757_v28 = vpop.f32.mrf.mxu1 }
 0x123   : > { %v1832_v31 = vpop.f32.mrf.mxu0  ;;  %v1850_v32 = vpop.f32.mrf.mxu1 }
 0x124   : > { %v594_v37 = vpack.c.bf16 %v1832_v31, %v1831_v25  ;;  %v779_v38 = vpack.c.bf16 %v1850_v32, %v1849_v26 }
 0x125   : > { %v575_v33 = vpop.f32.mrf.mxu0  ;;  %v760_v34 = vpop.f32.mrf.mxu1 }
 0x126   : > { %v593_v35 = vpack.c.bf16 %v575_v33, %v572_v27  ;;  %v778_v36 = vpack.c.bf16 %v760_v34, %v757_v28 }
 0x128   : > { %955 = vmatmul.mubr.bf16.gmra.mxu0 %v775_v18  ;;  %1148 = vmatmul.mubr.bf16.gmra.mxu1 %v590_v17 }
 0x129   : > { %964 = vmatprep.mubr.bf16.mxu0 %v2245_v54  ;;  %1157 = vmatprep.mubr.bf16.mxu1 %v2245_v54 }
 0x130   : > { %965 = vmatmul.mubr.bf16.gmra.mxu0 %v776_v24  ;;  %1158 = vmatmul.mubr.bf16.gmra.mxu1 %v591_v23 }
 0x131   : > { %974 = vmatprep.mubr.bf16.mxu0 %v2245_v54  ;;  %1167 = vmatprep.mubr.bf16.mxu1 %v2245_v54 }
 0x138   : > { %975 = vmatmul.mubr.bf16.gmra.mxu0 %v777_v30  ;;  %1168 = vmatmul.mubr.bf16.gmra.mxu1 %v592_v29 }
 0x139   : > { %984 = vmatprep.mubr.bf16.mxu0 %v2245_v54  ;;  %1177 = vmatprep.mubr.bf16.mxu1 %v2245_v54 }
 0x140   : > { %985 = vmatmul.mubr.bf16.gmra.mxu0 %v778_v36  ;;  %1178 = vmatmul.mubr.bf16.gmra.mxu1 %v593_v35 }
 0x141   : > { %994 = vmatprep.mubr.bf16.mxu0 %v2245_v54  ;;  %1187 = vmatprep.mubr.bf16.mxu1 %v2245_v54 }
 0x148   : > { %995 = vmatmul.mubr.bf16.gmra.mxu0 %v779_v38  ;;  %1188 = vmatmul.mubr.bf16.gmra.mxu1 %v594_v37 }
 0x149   : > { %1867 = vmatprep.mubr.msk.bf16.mxu0 %vm2247_vm1, %v2246_v40 }
 0x1d0   : > { %v926_v46 = vpop.f32.mrf.mxu0  ;;  %v1119_v47 = vpop.f32.mrf.mxu1 }
 0x1d1   : > { %v1120_v48 = vadd.f32 %v1119_v47, %v926_v46 }
 0x1d2   : > { %v928_v50 = vpop.f32.mrf.mxu0  ;;  %v1121_v51 = vpop.f32.mrf.mxu1 }
 0x1d3   : > { %v1210_v52 = vadd.f32 %v2496_v45, %v1120_v48  ;;  %v1122_v53 = vadd.f32 %v1121_v51, %v928_v50 }
 0x1d4   : > { %v930_v54 = vpop.f32.mrf.mxu0  ;;  %v1123_v55 = vpop.f32.mrf.mxu1 }
 0x1d5   : > { %v1242_v56 = vsub.f32 0.0, %v1210_v52  ;;  %v2502_v57 = vadd.f32 %v2498_v49, %v1122_v53  ;;  %v1124_v58 = vadd.f32 %v1123_v55, %v930_v54 }
 0x1d6   : > { %v932_v59 = vpop.f32.mrf.mxu0  ;;  %v1125_v60 = vpop.f32.mrf.mxu1 }
 0x1d7   : > { %v1354_v61 = vand.u32 2147483647, %v2502_v57  ;;  %v1212_v62 = vadd.f32 %v2496_v45, %v1124_v58  ;;  %v1258_v63 = vmul.f32 1.442695, %v1242_v56  ;;  %v1126_v0 = vadd.f32 %v1125_v60, %v932_v59 }
 0x1d8   : > { %v936_v1 = vpop.f32.mrf.mxu0  ;;  %v1129_v2 = vpop.f32.mrf.mxu1 }
 0x1d9   : > { %v1370_v3 = vsub.f32 0.0, %v1354_v61  ;;  %v1243_v4 = vsub.f32 0.0, %v1212_v62  ;;  %v1130_v5 = vadd.f32 %v1129_v2, %v936_v1  ;;  %v2507_v6 = vadd.f32 %v2498_v49, %v1126_v0 }
 0x1da   : > { %v938_v7 = vpop.f32.mrf.mxu0  ;;  %v1131_v8 = vpop.f32.mrf.mxu1  ;;  %2006 = vpow2.f32 %v1258_v63 }
 0x1db   : > { %v1386_v9 = vmul.f32 1.442695, %v1370_v3  ;;  %v1214_v10 = vadd.f32 %v2496_v45, %v1130_v5  ;;  %v1132_v11 = vadd.f32 %v1131_v8, %v938_v7  ;;  %v1260_v12 = vmul.f32 1.442695, %v1243_v4 }
 0x1dc   : > { %v1355_v13 = vand.u32 2147483647, %v2507_v6  ;;  %v940_v14 = vpop.f32.mrf.mxu0  ;;  %v1133_v15 = vpop.f32.mrf.mxu1 }
 0x1dd   : > { %2008 = vpow2.f32 %v1386_v9  ;;  %v1244_v16 = vsub.f32 0.0, %v1214_v10  ;;  %v2512_v17 = vadd.f32 %v2498_v49, %v1132_v11  ;;  %v1134_v18 = vadd.f32 %v1133_v15, %v940_v14 }
 0x1de   : > { %v1371_v19 = vsub.f32 0.0, %v1355_v13  ;;  %v942_v20 = vpop.f32.mrf.mxu0  ;;  %v1135_v21 = vpop.f32.mrf.mxu1  ;;  %2010 = vpow2.f32 %v1260_v12 }
 0x1df   : > { %v1356_v22 = vand.u32 2147483647, %v2512_v17  ;;  %v1216_v23 = vadd.f32 %v2496_v45, %v1134_v18  ;;  %v1262_v25 = vmul.f32 1.442695, %v1244_v16  ;;  %v1136_v26 = vadd.f32 %v1135_v21, %v942_v20 }
 0x1e0   : > { %v1388_v24 = vmul.f32 1.442695, %v1371_v19  ;;  %v946_v27 = vpop.f32.mrf.mxu0  ;;  %v1139_v28 = vpop.f32.mrf.mxu1 }
 0x1e1   : > { %v1372_v29 = vsub.f32 0.0, %v1356_v22  ;;  %v1245_v30 = vsub.f32 0.0, %v1216_v23  ;;  %v1140_v31 = vadd.f32 %v1139_v28, %v946_v27  ;;  %v2517_v32 = vadd.f32 %v2498_v49, %v1136_v26 }
 0x1e2   : > { %2012 = vpow2.f32 %v1388_v24  ;;  %v948_v33 = vpop.f32.mrf.mxu0  ;;  %v1141_v34 = vpop.f32.mrf.mxu1 }
 0x1e3   : > { %v1390_v35 = vmul.f32 1.442695, %v1372_v29  ;;  %v1218_v36 = vadd.f32 %v2496_v45, %v1140_v31  ;;  %v1142_v37 = vadd.f32 %v1141_v34, %v948_v33  ;;  %2014 = vpow2.f32 %v1262_v25 }
 0x1e4   : > { %v1357_v38 = vand.u32 2147483647, %v2517_v32  ;;  %v950_v39 = vpop.f32.mrf.mxu0  ;;  %v1143_v41 = vpop.f32.mrf.mxu1  ;;  %v1264_v42 = vmul.f32 1.442695, %v1245_v30 }
 0x1e5   : > { %2016 = vpow2.f32 %v1390_v35  ;;  %v2522_v43 = vadd.f32 %v2498_v49, %v1142_v37  ;;  %v1144_v44 = vadd.f32 %v1143_v41, %v950_v39  ;;  %v1246_v47 = vsub.f32 0.0, %v1218_v36 }
 0x1e6   : > { %v1373_v46 = vsub.f32 0.0, %v1357_v38  ;;  %v952_v48 = vpop.f32.mrf.mxu0  ;;  %v1145_v50 = vpop.f32.mrf.mxu1  ;;  %2018 = vpow2.f32 %v1264_v42 }
 0x1e7   : > { %v1358_v51 = vand.u32 2147483647, %v2522_v43  ;;  %v1220_v53 = vadd.f32 %v2496_v45, %v1144_v44  ;;  %v1146_v54 = vadd.f32 %v1145_v50, %v952_v48  ;;  %v2007_v58 = vpop.eup %2006  ;;  %v1266_v61 = vmul.f32 1.442695, %v1246_v47 }
 0x1e8   : > { %v1392_v52 = vmul.f32 1.442695, %v1373_v46  ;;  %v2527_v55 = vpop.f32.mrf.mxu0  ;;  %v2529_v56 = vpop.f32.mrf.mxu1  ;;  %v1290_v4 = vadd.f32 1.0, %v2007_v58  ;;  %v1338_v44 = vmax.f32 %v2502_v57, 0.0  ;;  %v1339_v57 = vmax.f32 %v2507_v6, 0.0 }
 0x1e9   : > { %v1374_v59 = vsub.f32 0.0, %v1358_v51  ;;  %v1247_v62 = vsub.f32 0.0, %v1220_v53  ;;  %v2532_v63 = vadd.f32 %v2498_v49, %v1146_v54 }
 0x1ea   : > { %v2009_v60 = vpop.eup %2008  ;;  %2020 = vpow2.f32 %v1392_v52  ;;  %v2534_v0 = vpop.f32.mrf.mxu0 }
 0x1eb   : > { %v2536_v1 = vpop.f32.mrf.mxu1  ;;  %v1418_v2 = vadd.f32 1.0, %v2009_v60  ;;  %v1394_v3 = vmul.f32 1.442695, %v1374_v59  ;;  %v1359_v5 = vand.u32 2147483647, %v2532_v63  ;;  %v2011_v10 = vpop.eup %2010 }
 0x1ec   : > { %v2539_v7 = vpop.f32.mrf.mxu0  ;;  %v1268_v9 = vmul.f32 1.442695, %v1247_v62  ;;  %v1291_v22 = vadd.f32 1.0, %v2011_v10 }
 0x1ed   : > { %v2541_v8 = vpop.f32.mrf.mxu1  ;;  %2022 = vlog2.f32 %v1418_v2  ;;  %v1375_v11 = vsub.f32 0.0, %v1359_v5 }
 0x1ee   : > { %2024 = vpow2.f32 %v1266_v61  ;;  %v2543_v12 = vpop.f32.mrf.mxu0 }
 0x1ef   : > { %v2545_v13 = vpop.f32.mrf.mxu1  ;;  %v2013_v14 = vpop.eup %2012  ;;  %2026 = vpow2.f32 %v1394_v3  ;;  %v1396_v16 = vmul.f32 1.442695, %v1375_v11 }
 0x1f0   : > { %2028 = vrcp.f32 %v1290_v4  ;;  %v1419_v15 = vadd.f32 1.0, %v2013_v14  ;;  %v2547_v18 = vpop.f32.mrf.mxu0  ;;  %v2015_v20 = vpop.eup %2014 }
 0x1f1   : > { %v2549_v19 = vpop.f32.mrf.mxu1  ;;  %2030 = vpow2.f32 %v1268_v9  ;;  %v1292_v28 = vadd.f32 1.0, %v2015_v20  ;;  %v1340_v20 = vmax.f32 %v2512_v17, 0.0  ;;  %v1152_v17 = vadd.f32 %v2536_v1, %v2534_v0 }
 0x1f2   : > { %v2017_v21 = vpop.eup %2016  ;;  %2032 = vlog2.f32 %v1419_v15  ;;  %v2551_v23 = vpop.f32.mrf.mxu0  ;;  %v1150_v0 = vadd.f32 %v2529_v56, %v2527_v55  ;;  %v1154_v1 = vadd.f32 %v2541_v8, %v2539_v7  ;;  %v1342_v8 = vmax.f32 %v2522_v43, 0.0 }
 0x1f3   : > { %v2553_v24 = vpop.f32.mrf.mxu1  ;;  %v1420_v25 = vadd.f32 1.0, %v2017_v21  ;;  %2034 = vpow2.f32 %v1396_v16  ;;  %v2019_v29 = vpop.eup %2018 }
 0x1f4   : > { %v2555_v26 = vpop.f32.mrf.mxu0  ;;  %v1293_v38 = vadd.f32 1.0, %v2019_v29 }
 0x1f5   : > { %v2557_v27 = vpop.f32.mrf.mxu1  ;;  %2036 = vlog2.f32 %v1420_v25 }
 0x1f6   : > { %2038 = vrcp.f32 %v1291_v22  ;;  %v972_v30 = vpop.f32.mrf.mxu0 }
 0x1f7   : > { %v1165_v31 = vpop.f32.mrf.mxu1  ;;  %v2021_v33 = vpop.eup %2020  ;;  %2040 = vrcp.f32 %v1292_v28 }
 0x1f8   : > { %v1421_v34 = vadd.f32 1.0, %v2021_v33  ;;  %v2559_v35 = vpop.f32.mrf.mxu0  ;;  %v1166_v6 = vadd.f32 %v1165_v31, %v972_v30 }
 0x1f9   : > { %v2561_v36 = vpop.f32.mrf.mxu1 }
 0x1fa   : > { %v2023_v37 = vpop.eup %2022  ;;  %2042 = vlog2.f32 %v1421_v34  ;;  %v978_v39 = vpop.f32.mrf.mxu0  ;;  %v2588_v30 = vadd.f32 %v2498_v49, %v1166_v6 }
 0x1fb   : > { %v1171_v41 = vpop.f32.mrf.mxu1  ;;  %v2025_v42 = vpop.eup %2024  ;;  %v1435_v46 = vmul.f32 0.6931472, %v2023_v37  ;;  %2044 = vrcp.f32 %v1293_v38  ;;  %v1341_v37 = vmax.f32 %v2517_v32, 0.0  ;;  %v1156_v32 = vadd.f32 %v2545_v13, %v2543_v12 }
 0x1fc   : > { %v2027_v47 = vpop.eup %2026  ;;  %v2564_v48 = vpop.f32.mrf.mxu0  ;;  %v1294_v58 = vadd.f32 1.0, %v2025_v42  ;;  %v1363_v55 = vand.u32 2147483647, %v2588_v30 }
 0x1fd   : > { %v2566_v50 = vpop.f32.mrf.mxu1  ;;  %v2029_v51 = vpop.eup %2028  ;;  %v1466_v52 = vadd.f32 %v1435_v46, %v1338_v44  ;;  %v1422_v53 = vadd.f32 1.0, %v2027_v47  ;;  %v1172_v47 = vadd.f32 %v1171_v41, %v978_v39  ;;  %v2599_v41 = vadd.f32 %v2498_v49, %v1152_v17 }
 0x1fe   : > { %v2031_v54 = vpop.eup %2030  ;;  %v982_v59 = vpop.f32.mrf.mxu0 }
 0x1ff   : > { %v1175_v60 = vpop.f32.mrf.mxu1  ;;  %v2033_v61 = vpop.eup %2032  ;;  %v2568_v62 = vmul.f32 %v2029_v51, %v1466_v52  ;;  %2046 = vlog2.f32 %v1422_v53  ;;  %v1295_v22 = vadd.f32 1.0, %v2031_v54  ;;  %v1360_v43 = vand.u32 2147483647, %v2599_v41 }
 0x200   : > { %v2035_v2 = vpop.eup %2034  ;;  %v1437_v3 = vmul.f32 0.6931472, %v2033_v61  ;;  %v2571_v4 = vpop.f32.mrf.mxu0  ;;  %2048 = vrcp.f32 %v1294_v58  ;;  %v1176_v31 = vadd.f32 %v1175_v60, %v982_v59  ;;  %v1162_v58 = vadd.f32 %v2553_v24, %v2551_v23 }
 0x201   : > { %v2573_v5 = vpop.f32.mrf.mxu1  ;;  %v1423_v9 = vadd.f32 1.0, %v2035_v2  ;;  %v2602_v59 = vadd.f32 %v2498_v49, %v1172_v47 }
 0x202   : > { %v2037_v10 = vpop.eup %2036  ;;  %v1467_v11 = vadd.f32 %v1437_v3, %v1339_v57  ;;  %v988_v14 = vpop.f32.mrf.mxu0  ;;  %v2611_v56 = vadd.f32 %v2498_v49, %v1176_v31  ;;  %v2618_v3 = vadd.f32 %v2498_v49, %v1156_v32 }
 0x203   : > { %v1181_v15 = vpop.f32.mrf.mxu1  ;;  %v2039_v16 = vpop.eup %2038  ;;  %v1439_v21 = vmul.f32 0.6931472, %v2037_v10  ;;  %2050 = vlog2.f32 %v1423_v9  ;;  %v2621_v9 = vadd.f32 %v2498_v49, %v1162_v58  ;;  %v1343_v10 = vmax.f32 %v2532_v63, 0.0 }
 0x204   : > { %v2576_v25 = vmul.f32 %v2039_v16, %v1467_v11  ;;  %v2578_v28 = vpop.f32.mrf.mxu0  ;;  %v2041_v34 = vpop.eup %2040  ;;  %2052 = vrcp.f32 %v1295_v22  ;;  %v1182_v52 = vadd.f32 %v1181_v15, %v988_v14  ;;  %v2625_v11 = vadd.f32 %v2496_v45, %v1150_v0 }
 0x205   : > { %v2580_v29 = vpop.f32.mrf.mxu1  ;;  %v1468_v33 = vadd.f32 %v1439_v21, %v1340_v20  ;;  %v2628_v14 = vadd.f32 %v2496_v45, %v1154_v1  ;;  %v1364_v21 = vand.u32 2147483647, %v2602_v59  ;;  %v2636_v63 = vadd.f32 %v2549_v19, %v2547_v18 }
 0x206   : > { %v992_v38 = vpop.f32.mrf.mxu0  ;;  %v2605_v12 = vadd.f32 %v2498_v49, %v1182_v52  ;;  %v1361_v47 = vand.u32 2147483647, %v2618_v3  ;;  %v1184_v18 = vadd.f32 %v2580_v29, %v2578_v28  ;;  %v1164_v1 = vadd.f32 %v2557_v27, %v2555_v26 }
 0x207   : > { %v1185_v42 = vpop.f32.mrf.mxu1  ;;  %v2043_v44 = vpop.eup %2042  ;;  %v2583_v46 = vmul.f32 %v2041_v34, %v1468_v33  ;;  %v1170_v27 = vadd.f32 %v2561_v36, %v2559_v35 }
 0x208   : > { %v1441_v51 = vmul.f32 0.6931472, %v2043_v44  ;;  %v996_v53 = vpop.f32.mrf.mxu0  ;;  %v1186_v61 = vadd.f32 %v1185_v42, %v992_v38  ;;  %v2045_v39 = vpop.eup %2044  ;;  %v1366_v15 = vand.u32 2147483647, %v2605_v12  ;;  %v1365_v38 = vand.u32 2147483647, %v2611_v56 }
 0x209   : > { %v1189_v54 = vpop.f32.mrf.mxu1 }
 0x20a   : > { %v1469_v2 = vadd.f32 %v1441_v51, %v1341_v37  ;;  %v998_v13 = vpop.f32.mrf.mxu0  ;;  %v2614_v7 = vadd.f32 %v2498_v49, %v1186_v61  ;;  %v1379_v37 = vsub.f32 0.0, %v1363_v55  ;;  %v1190_v42 = vadd.f32 %v1189_v54, %v996_v53 }
 0x20b   : > { %v1191_v23 = vpop.f32.mrf.mxu1  ;;  %v1362_v51 = vand.u32 2147483647, %v2621_v9  ;;  %v1382_v31 = vsub.f32 0.0, %v1366_v15  ;;  %v1381_v55 = vsub.f32 0.0, %v1365_v38  ;;  %v1498_v38 = vpack.c.bf16 %v2576_v25, %v2568_v62 }
 0x20c   : > { %v2047_v24 = vpop.eup %2046  ;;  %v2607_v60 = vmul.f32 %v2045_v39, %v1469_v2  ;;  %v1367_v22 = vand.u32 2147483647, %v2614_v7  ;;  %v1000_v6 = vpop.f32.mrf.mxu0  ;;  %v1238_v32 = vadd.f32 %v2496_v45, %v1190_v42  ;;  %v1192_v58 = vadd.f32 %v1191_v23, %v998_v13 }
 0x20d   : > { %v1443_v57 = vmul.f32 0.6931472, %v2047_v24  ;;  %v2049_v16 = vpop.eup %2048  ;;  %v1193_v33 = vpop.f32.mrf.mxu1  ;;  %v1380_v2 = vsub.f32 0.0, %v1364_v21  ;;  %v1404_v39 = vmul.f32 1.442695, %v1379_v37  ;;  %v1174_v24 = vadd.f32 %v2566_v50, %v2564_v48 }
 0x20e   : > { %v1383_v52 = vsub.f32 0.0, %v1367_v22  ;;  %v1194_v19 = vadd.f32 %v1193_v33, %v1000_v6  ;;  %v1002_v0 = vpop.f32.mrf.mxu0  ;;  %v1180_v13 = vadd.f32 %v2573_v5, %v2571_v4  ;;  %v2655_v28 = vadd.f32 %v2498_v49, %v1192_v58 }
 0x20f   : > { %v1470_v20 = vadd.f32 %v1443_v57, %v1342_v8  ;;  %v1195_v53 = vpop.f32.mrf.mxu1  ;;  %v1410_v29 = vmul.f32 1.442695, %v1382_v31  ;;  %v1256_v57 = vsub.f32 0.0, %v1238_v32  ;;  %v1378_v26 = vsub.f32 0.0, %v1362_v51 }
 0x210   : > { %v2051_v34 = vpop.eup %2050  ;;  %v1412_v23 = vmul.f32 1.442695, %v1383_v52  ;;  %v1196_v15 = vadd.f32 %v1195_v53, %v1002_v0  ;;  %v1406_v48 = vmul.f32 1.442695, %v1380_v2  ;;  %v1236_v50 = vadd.f32 %v2496_v45, %v1184_v18 }
 0x211   : > { %v2639_v44 = vmul.f32 %v2049_v16, %v1470_v20  ;;  %v1445_v17 = vmul.f32 0.6931472, %v2051_v34  ;;  %v2053_v54 = vpop.eup %2052  ;;  %2054 = vpow2.f32 %v1404_v39  ;;  %v1408_v16 = vmul.f32 1.442695, %v1381_v55 }
 0x212   : > { %v1368_v4 = vand.u32 2147483647, %v2655_v28  ;;  %v1234_v20 = vadd.f32 %v2496_v45, %v1180_v13  ;;  %2056 = vpow2.f32 %v1412_v23  ;;  %v2664_v21 = vadd.f32 %v2498_v49, %v1196_v15 }
 0x213   : > { %v1471_v61 = vadd.f32 %v1445_v17, %v1343_v10  ;;  %v1240_v10 = vadd.f32 %v2496_v45, %v1194_v19  ;;  %v1232_v6 = vadd.f32 %v2496_v45, %v1174_v24  ;;  %2058 = vpow2.f32 %v1410_v29 }
 0x214   : > { %v1286_v35 = vmul.f32 1.442695, %v1256_v57  ;;  %v1384_v36 = vsub.f32 0.0, %v1368_v4  ;;  %v1255_v33 = vsub.f32 0.0, %v1236_v50  ;;  %v1369_v34 = vand.u32 2147483647, %v2664_v21 }
 0x215   : > { %v2650_v8 = vmul.f32 %v2053_v54, %v1471_v61  ;;  %v1257_v5 = vsub.f32 0.0, %v1240_v10  ;;  %v1499_v37 = vpack.c.bf16 %v2607_v60, %v2583_v46  ;;  %v1377_v42 = vsub.f32 0.0, %v1361_v47 }
 0x216   : > { %2060 = vpow2.f32 %v1408_v16  ;;  %v1414_v49 = vmul.f32 1.442695, %v1384_v36  ;;  %v1230_v51 = vadd.f32 %v2496_v45, %v1170_v27  ;;  %v1254_v31 = vsub.f32 0.0, %v1234_v20 }
 0x217   : > { %v1500_v22 = vpack.c.bf16 %v2650_v8, %v2639_v44  ;;  %v1288_v17 = vmul.f32 1.442695, %v1257_v5  ;;  %2062 = vpow2.f32 %v1406_v48  ;;  %v1385_v52 = vsub.f32 0.0, %v1369_v34  ;;  %v1506_v44 = vld [vmem:[#allocation7] sm:$0xff] }
 0x218   : > { %v1376_v32 = vsub.f32 0.0, %v1360_v43  ;;  %v1402_v58 = vmul.f32 1.442695, %v1378_v26  ;;  %v1228_v61 = vadd.f32 %v2496_v45, %v1164_v1  ;;  %2064 = vpow2.f32 %v1286_v35 }
 0x219   : > { %v1253_v2 = vsub.f32 0.0, %v1232_v6  ;;  %v1284_v18 = vmul.f32 1.442695, %v1255_v33  ;;  %2066 = vpow2.f32 %v1414_v49  ;;  %v1416_v19 = vmul.f32 1.442695, %v1385_v52 }
 0x21a   : > { %v1248_v47 = vsub.f32 0.0, %v2625_v11  ;;  %v1400_v0 = vmul.f32 1.442695, %v1377_v42  ;;  %v1226_v53 = vadd.f32 %v2496_v45, %v2636_v63  ;;  %2068 = vpow2.f32 %v1288_v17 }
 0x21b   : > { %v1252_v54 = vsub.f32 0.0, %v1230_v51  ;;  %v1282_v39 = vmul.f32 1.442695, %v1254_v31  ;;  %2070 = vpow2.f32 %v1416_v19  ;;  %v1398_v24 = vmul.f32 1.442695, %v1376_v32 }
 0x21c   : > { %2072 = vpow2.f32 %v1402_v58  ;;  %v1251_v43 = vsub.f32 0.0, %v1228_v61  ;;  %v1249_v1 = vsub.f32 0.0, %v2628_v14  ;;  %v1280_v55 = vmul.f32 1.442695, %v1253_v2 }
 0x21d   : > { %2074 = vpow2.f32 %v1284_v18  ;;  %v1270_v13 = vmul.f32 1.442695, %v1248_v47  ;;  %v1250_v23 = vsub.f32 0.0, %v1226_v53  ;;  %v1278_v11 = vmul.f32 1.442695, %v1252_v54 }
 0x21e   : > { %2076 = vpow2.f32 %v1400_v0  ;;  %v2055_v29 = vpop.eup %2054  ;;  %v1276_v45 = vmul.f32 1.442695, %v1251_v43  ;;  %v1272_v10 = vmul.f32 1.442695, %v1249_v1 }
 0x21f   : > { %2078 = vpow2.f32 %v1282_v39  ;;  %v2057_v57 = vpop.eup %2056  ;;  %v1274_v15 = vmul.f32 1.442695, %v1250_v23  ;;  %v1427_v35 = vadd.f32 1.0, %v2055_v29 }
 0x220   : > { %2080 = vpow2.f32 %v1398_v24  ;;  %v2059_v63 = vpop.eup %2058  ;;  %v1431_v27 = vadd.f32 1.0, %v2057_v57 }
 0x221   : > { %2082 = vpow2.f32 %v1280_v55  ;;  %v1430_v48 = vadd.f32 1.0, %v2059_v63 }
 0x222   : > { %2084 = vpow2.f32 %v1270_v13 }
 0x223   : > { %v2061_v26 = vpop.eup %2060  ;;  %2086 = vpow2.f32 %v1278_v11 }
 0x224   : > { %v2063_v14 = vpop.eup %2062  ;;  %2088 = vpow2.f32 %v1276_v45  ;;  %v1429_v4 = vadd.f32 1.0, %v2061_v26  ;;  %v1352_v45 = vmax.f32 %v2655_v28, 0.0  ;;  %v1351_v26 = vmax.f32 %v2614_v7, 0.0 }
 0x225   : > { %v2065_v50 = vpop.eup %2064  ;;  %2090 = vpow2.f32 %v1272_v10  ;;  %v1428_v33 = vadd.f32 1.0, %v2063_v14 }
 0x226   : > { %v2067_v16 = vpop.eup %2066  ;;  %2092 = vpow2.f32 %v1274_v15  ;;  %v1304_v49 = vadd.f32 1.0, %v2065_v50  ;;  %v1353_v50 = vmax.f32 %v2664_v21, 0.0 }
 0x227   : > { %v2069_v5 = vpop.eup %2068  ;;  %2094 = vlog2.f32 %v1431_v27  ;;  %v1432_v20 = vadd.f32 1.0, %v2067_v16 }
 0x228   : > { %v2071_v6 = vpop.eup %2070  ;;  %2096 = vlog2.f32 %v1430_v48  ;;  %v1305_v51 = vadd.f32 1.0, %v2069_v5 }
 0x229   : > { %v2073_v36 = vpop.eup %2072  ;;  %2098 = vlog2.f32 %v1432_v20  ;;  %v1433_v34 = vadd.f32 1.0, %v2071_v6 }
 0x22a   : > { %v2075_v42 = vpop.eup %2074  ;;  %2100 = vlog2.f32 %v1429_v4  ;;  %v1426_v52 = vadd.f32 1.0, %v2073_v36 }
 0x22b   : > { %v2077_v17 = vpop.eup %2076  ;;  %2102 = vlog2.f32 %v1433_v34  ;;  %v1303_v58 = vadd.f32 1.0, %v2075_v42  ;;  %v1349_v34 = vmax.f32 %v2611_v56, 0.0 }
 0x22c   : > { %v2079_v31 = vpop.eup %2078  ;;  %2104 = vlog2.f32 %v1427_v35  ;;  %v1425_v2 = vadd.f32 1.0, %v2077_v17  ;;  %v1350_v35 = vmax.f32 %v2605_v12, 0.0 }
 0x22d   : > { %v2081_v32 = vpop.eup %2080  ;;  %2106 = vlog2.f32 %v1428_v33  ;;  %v1302_v19 = vadd.f32 1.0, %v2079_v31  ;;  %v1348_v31 = vmax.f32 %v2602_v59, 0.0 }
 0x22e   : > { %v2083_v61 = vpop.eup %2082  ;;  %2108 = vrcp.f32 %v1304_v49  ;;  %v1424_v0 = vadd.f32 1.0, %v2081_v32 }
 0x22f   : > { %v2085_v18 = vpop.eup %2084  ;;  %2110 = vrcp.f32 %v1305_v51  ;;  %v1301_v54 = vadd.f32 1.0, %v2083_v61 }
 0x230   : > { %v2087_v47 = vpop.eup %2086  ;;  %2112 = vlog2.f32 %v1426_v52  ;;  %v1296_v5 = vadd.f32 1.0, %v2085_v18 }
 0x231   : > { %v2089_v53 = vpop.eup %2088  ;;  %2114 = vrcp.f32 %v1303_v58  ;;  %v1300_v43 = vadd.f32 1.0, %v2087_v47  ;;  %v1347_v47 = vmax.f32 %v2588_v30, 0.0 }
 0x232   : > { %v2091_v39 = vpop.eup %2090  ;;  %2116 = vlog2.f32 %v1425_v2  ;;  %v1299_v55 = vadd.f32 1.0, %v2089_v53 }
 0x233   : > { %v2093_v24 = vpop.eup %2092  ;;  %2118 = vrcp.f32 %v1302_v19  ;;  %v1297_v15 = vadd.f32 1.0, %v2091_v39 }
 0x234   : > { %v2095_v1 = vpop.eup %2094  ;;  %2120 = vlog2.f32 %v1424_v0  ;;  %v1298_v29 = vadd.f32 1.0, %v2093_v24 }
 0x235   : > { %v2097_v13 = vpop.eup %2096  ;;  %2122 = vrcp.f32 %v1301_v54  ;;  %v1461_v57 = vmul.f32 0.6931472, %v2095_v1  ;;  %v1346_v54 = vmax.f32 %v2621_v9, 0.0 }
 0x236   : > { %v2099_v23 = vpop.eup %2098  ;;  %2124 = vrcp.f32 %v1300_v43  ;;  %v1459_v14 = vmul.f32 0.6931472, %v2097_v13 }
 0x237   : > { %v2101_v11 = vpop.eup %2100  ;;  %v1463_v63 = vmul.f32 0.6931472, %v2099_v23  ;;  %2126 = vrcp.f32 %v1299_v55  ;;  %v1479_v28 = vadd.f32 %v1461_v57, %v1351_v26  ;;  %v1345_v23 = vmax.f32 %v2618_v3, 0.0 }
 0x238   : > { %v2103_v10 = vpop.eup %2102  ;;  %2128 = vrcp.f32 %v1298_v29  ;;  %v1457_v6 = vmul.f32 0.6931472, %v2101_v11  ;;  %v1478_v49 = vadd.f32 %v1459_v14, %v1350_v35  ;;  %v1344_v57 = vmax.f32 %v2599_v41, 0.0  ;;  %v2005_v41 = vld [vmem:[%s2750_s4] sm:$0xff]  }
 0x239   : > { %v2105_v27 = vpop.eup %2104  ;;  %v1480_v48 = vadd.f32 %v1463_v63, %v1352_v45  ;;  %v1465_v16 = vmul.f32 0.6931472, %v2103_v10  ;;  %2130 = vrcp.f32 %v1297_v15 }
 0x23a   : > { %v2107_v4 = vpop.eup %2106  ;;  %2132 = vrcp.f32 %v1296_v5  ;;  %v1453_v32 = vmul.f32 0.6931472, %v2105_v27  ;;  %v1477_v58 = vadd.f32 %v1457_v6, %v1349_v34 }
 0x23b   : > { %v2109_v20 = vpop.eup %2108  ;;  %v1481_v36 = vadd.f32 %v1465_v16, %v1353_v50  ;;  %v1455_v42 = vmul.f32 0.6931472, %v2107_v4  ;;  %v1507_v4 = vld [vmem:[#allocation7 + $0x8] sm:$0xff] }
 0x23c   : > { %v2111_v33 = vpop.eup %2110  ;;  %v1496_v17 = vmul.f32 %v2109_v20, %v1480_v48  ;;  %v1475_v59 = vadd.f32 %v1453_v32, %v1347_v47 }
 0x23d   : > { %v2113_v7 = vpop.eup %2112  ;;  %v1497_v51 = vmul.f32 %v2111_v33, %v1481_v36  ;;  %v1476_v56 = vadd.f32 %v1455_v42, %v1348_v31 }
 0x23e   : > { %v2115_v21 = vpop.eup %2114  ;;  %v1451_v19 = vmul.f32 0.6931472, %v2113_v7 }
 0x23f   : > { %v2117_v52 = vpop.eup %2116  ;;  %v1495_v61 = vmul.f32 %v2115_v21, %v1479_v28  ;;  %v1505_v12 = vpack.c.bf16 %v1497_v51, %v1496_v17 }
 0x240   : > { %v2119_v2 = vpop.eup %2118  ;;  %v1449_v39 = vmul.f32 0.6931472, %v2117_v52  ;;  %v1474_v29 = vadd.f32 %v1451_v19, %v1346_v54 }
 0x241   : > { %v2121_v18 = vpop.eup %2120  ;;  %v1494_v0 = vmul.f32 %v2119_v2, %v1478_v49  ;;  %1852 = vmatpush3.bf16.msra.mxu0 %v1505_v12 }
 0x242   : > { %v2123_v53 = vpop.eup %2122  ;;  %1853 = vmatprep.subr.bf16.mxu0 %v2246_v40  ;;  %v1447_v13 = vmul.f32 0.6931472, %v2121_v18  ;;  %v1473_v9 = vadd.f32 %v1449_v39, %v1345_v23 }
 0x243   : > { %v1493_v24 = vmul.f32 %v2123_v53, %v1477_v58  ;;  %v1504_v43 = vpack.c.bf16 %v1495_v61, %v1494_v0  ;;  %v2125_v1 = vpop.eup %2124 }
 0x244   : > { %v2127_v55 = vpop.eup %2126  ;;  %v1492_v11 = vmul.f32 %v2125_v1, %v1476_v56  ;;  %v1472_v15 = vadd.f32 %v1447_v13, %v1344_v57 }
 0x245   : > { %1854 = vmatpush3.bf16.msra.mxu0 %v1504_v43  ;;  %v2129_v30 = vpop.eup %2128  ;;  %v1491_v45 = vmul.f32 %v2127_v55, %v1475_v59 }
 0x246   : > { %1855 = vmatprep.subr.bf16.mxu0 %v2246_v40  ;;  %v1503_v63 = vpack.c.bf16 %v1493_v24, %v1492_v11  ;;  %v2131_v10 = vpop.eup %2130  ;;  %v1490_v26 = vmul.f32 %v2129_v30, %v1474_v29 }
 0x247   : > { %v2133_v27 = vpop.eup %2132  ;;  %v1489_v14 = vmul.f32 %v2131_v10, %v1473_v9 }
 0x248   : > { %v1502_v3 = vpack.c.bf16 %v1491_v45, %v1490_v26  ;;  %v1488_v48 = vmul.f32 %v2133_v27, %v1472_v15 }
 0x249   : > { %1856 = vmatpush3.bf16.msra.mxu0 %v1503_v63 }
 0x24a   : > { %1857 = vmatprep.subr.bf16.mxu0 %v2246_v40  ;;  %v1501_v50 = vpack.c.bf16 %v1489_v14, %v1488_v48 }
 0x24d   : > { %1858 = vmatpush3.bf16.msra.mxu0 %v1502_v3 }
 0x24e   : > { %1859 = vmatprep.subr.bf16.mxu0 %v2246_v40 }
 0x251   : > { %1860 = vmatpush3.bf16.msra.mxu0 %v1501_v50 }
 0x252   : > { %1861 = vmatprep.subr.bf16.mxu0 %v2246_v40 }
 0x255   : > { %1862 = vmatpush3.bf16.msra.mxu0 %v1500_v22 }
 0x256   : > { %1863 = vmatprep.subr.bf16.mxu0 %v2246_v40 }
 0x259   : > { %1864 = vmatpush3.bf16.msra.mxu0 %v1499_v37 }
 0x25a   : > { %1865 = vmatprep.subr.bf16.mxu0 %v2246_v40 }
 0x25d   : > { %1866 = vmatpush3.bf16.msra.mxu0 %v1498_v38 }
 0x260   : > { %1868 = vmatmul.mubr.bf16.vlgmr.msra.gmra.mxu0 %v2005_v41 }
 0x320   : > { %v1550_v8 = vpop.f32.mrf.mxu0 }
 0x321   : > { %v1557_v22 = vadd.f32 %v1550_v8, %v1506_v44 }
 0x322   : > { %v1869_v16 = vpop.f32.mrf.mxu0 }
 0x323   : > { %v1566_v5 = vmax.f32 %v1557_v22, 0.0 }
 0x324   : > { %v1553_v46 = vpop.f32.mrf.mxu0 }
 0x325   : > { %1568 = vst [vmem:[#allocation7] sm:$0xff] %v1566_v5  ;;  %v1558_v40 = vadd.f32 %v1553_v46, %v1507_v4 }
 0x326   : > { %v1870_v60 = vpop.f32.mrf.mxu0 }
 0x327   : > { %v1567_v62 = vmax.f32 %v1558_v40, 0.0 }
 0x329   : > { %1569 = vst [vmem:[#allocation7 + $0x8] sm:$0xff] %v1567_v62 }
 0x32a   : > { %2175 = shalt.err (!%p2172_p2)
}
 0x32b   : > { %s2249_s16 = smov 128   ;;  %s2250_s29 = smov 8  }
 0x32c   : > { %1874 = dma.vmem_to_hbm [thread:$0]  (%p2713_p7), %s1577_s13, 256, %s2753_s7, [#allocation6], %s2249_s16, %s2249_s16, %s2250_s29  }
 0x32d   : > { %2215 = dma.done.wait (%p2713_p7), [#allocation6], 256  }
 0x32e   : > { %2217 = vsyncadd (%p2713_p7), [#allocation6], 4294967040 }
 0x32f PF: > { %s22_s28 = sadd.s32 1, %s2240_s28   ;;  %s2758_s23 = smov %s2224_s24 }
 0x330   : > { %p19_p3 = scmp.ge.s32.totalorder %s22_s28, 5   ;;  %s2759_s24 = smov %s2228_s25 }
 0x331   : > { %s2760_s25 = smov %s2342_s12  ;;  %s2761_s26 = smov %s2236_s27 }
 0x332   : > { %s2762_s27 = smov %s2764_s30  ;;  %21 = sbr.rel (!%p19_p3) target bundleno = 5 (0x5), region = 109 }
 0x337   :  { %1592 = vsyncpa [#allocation5], 1 }
 0x338   :  { %1594 = vsyncpa [#allocation5 + $0x1], 1 }
 0x339   :  { %1595 = vsyncpa [#allocation6], 1 }
 0x33a   :  { %1597 = vsyncpa [#allocation6 + $0x1], 1 }

</bundles_post_ra>
